<compile_context>
chip_gen: v7x
topology: tpu7x:2x2x1
jax: 0.10.0
libtpu: 0.0.40
codegen_flags: <defaults>
</compile_context>

<pallas_src>
import functools
import numpy as np

import jax
import jax.numpy as jnp
from jax.experimental import pallas as pl
from jax.experimental.pallas import tpu as pltpu

# Gaussian kernel alphas per layer (deterministic "parameters" of the module).
LAYER_ALPHAS = ((0.5, 1.0, 2.0), (1.5,))
LINEAR = True  # module default; the Pallas kernel implements the linear path.


def _build_index_matrix(batch_size: int, linear: bool = True) -> jnp.ndarray:
    """numpy glue mirroring _update_index_matrix (used only by the pure-JAX reference)."""
    n = 2 * batch_size
    idx = np.zeros((n, n), dtype=np.float32)
    if linear:
        for i in range(batch_size):
            s1, s2 = i, (i + 1) % batch_size
            t1, t2 = s1 + batch_size, s2 + batch_size
            idx[s1, s2] = 1.0 / batch_size
            idx[t1, t2] = 1.0 / batch_size
            idx[s1, t2] = -1.0 / batch_size
            idx[s2, t1] = -1.0 / batch_size
    else:
        for i in range(batch_size):
            for j in range(batch_size):
                if i != j:
                    idx[i, j] = 1.0 / (batch_size * (batch_size - 1))
                    idx[i + batch_size, j + batch_size] = 1.0 / (batch_size * (batch_size - 1))
        for i in range(batch_size):
            for j in range(batch_size):
                idx[i, j + batch_size] = -1.0 / (batch_size * batch_size)
                idx[i + batch_size, j] = -1.0 / (batch_size * batch_size)
    return jnp.asarray(idx)


def _jmmd_linear_kernel(*refs, alphas_per_layer, batch_size):
    """refs = (z_s^1, z_t^1, z_s^2, z_t^2, ..., out_ref); out_ref is SMEM (1,)."""
    out_ref = refs[-1]
    layer_refs = refs[:-1]
    b = batch_size
    inv_2b = 1.0 / float(2 * b)

    kprod = None  # (B, 4): product across layers of the per-pair kernel sums
    for l, alphas in enumerate(alphas_per_layer):
        zs = layer_refs[2 * l][...].astype(jnp.float32)        # (B, D_l)
        zt = layer_refs[2 * l + 1][...].astype(jnp.float32)    # (B, D_l)

        # Center features (pairwise distances are translation-invariant; this keeps
        # the closed-form mean(D2) and the norm expansion numerically well-behaved).
        f_bar = (jnp.sum(zs, axis=0, keepdims=True)
                 + jnp.sum(zt, axis=0, keepdims=True)) * inv_2b          # (1, D_l)
        zs_c = zs - f_bar
        zt_c = zt - f_bar

        # Row squared norms (B, 1); reused for mean(D2) AND the pair distances.
        ns = jnp.sum(zs_c * zs_c, axis=1, keepdims=True)
        nt = jnp.sum(zt_c * zt_c, axis=1, keepdims=True)

        # mean over all (2B)^2 entries of D2: 2 * mean_i ||f_i - f_bar||^2.
        mean_d2 = (jnp.sum(ns) + jnp.sum(nt)) / float(b)
        # Guard the all-identical-features case (PyTorch would return NaN there);
        # for any mean_d2 > 0 this is exactly the reference value.
        safe_mean_d2 = jnp.where(mean_d2 > 0.0, mean_d2, 1.0)
        inv_mean_d2 = 1.0 / safe_mean_d2                                  # hoisted scalar

        # Rolled copies: row i -> row (i+1) % B (XLU sublane rotate).
        zs_n = pltpu.roll(zs_c, shift=b - 1, axis=0)                      # (B, D_l)
        zt_n = pltpu.roll(zt_c, shift=b - 1, axis=0)
        ns_n = pltpu.roll(ns, shift=b - 1, axis=0)                        # (B, 1)
        nt_n = pltpu.roll(nt, shift=b - 1, axis=0)

        # Rowwise dot products of the 4 pair families (elementwise-mul + lane reduce).
        dot_ss = jnp.sum(zs_c * zs_n, axis=1, keepdims=True)              # (s_i, s_{i+1})
        dot_tt = jnp.sum(zt_c * zt_n, axis=1, keepdims=True)              # (t_i, t_{i+1})
        dot_st = jnp.sum(zs_c * zt_n, axis=1, keepdims=True)              # (s_i, t_{i+1})
        dot_ts = jnp.sum(zt_c * zs_n, axis=1, keepdims=True)              # (t_i, s_{i+1})

        # ||a - b||^2 via norm expansion, lane-dense layout (B, 4):
        #   col 0: (s_i, s_{i+1})  +1/B      col 2: (s_i, t_{i+1})  -1/B
        #   col 1: (t_i, t_{i+1})  +1/B      col 3: (t_i, s_{i+1})  -1/B
        d2 = jnp.concatenate(
            [ns + ns_n - 2.0 * dot_ss,
             nt + nt_n - 2.0 * dot_tt,
             ns + nt_n - 2.0 * dot_st,
             nt + ns_n - 2.0 * dot_ts], axis=1)                           # (B, 4)
        d2 = jnp.maximum(d2, 0.0)  # clamp tiny negative rounding residue

        layer_k = jnp.zeros_like(d2)
        for alpha in alphas:
            coef = (-0.5 / float(alpha)) * inv_mean_d2   # scalar; exp stays on the EUP
            layer_k = layer_k + jnp.exp(d2 * coef)
        kprod = layer_k if kprod is None else kprod * layer_k

    # Fold the +-1/B signs (cols 0,1 positive; cols 2,3 negative) and do ONE reduce.
    lane = jax.lax.broadcasted_iota(jnp.int32, kprod.shape, dimension=1)
    signed = jnp.where(lane < 2, kprod, -kprod)
    loss = jnp.sum(signed) / float(b) + 2.0 / float(b - 1)
    out_ref[0] = loss


def jmmd_loss(z_s, z_t):
    """z_s, z_t: tuples of per-layer activations, each (B, D_l) float32/bf16."""
    batch_size = z_s[0].shape[0]
    assert len(z_s) == len(z_t) == len(LAYER_ALPHAS)
    # B >= 3 so all 4B nonzero index-matrix entries are distinct (B=8 in the demo,
    # which also keeps the sublane rolls on an 8-aligned axis).
    assert batch_size >= 3

    flat_inputs = []
    for zl_s, zl_t in zip(z_s, z_t):
        assert zl_s.shape == zl_t.shape
        flat_inputs.extend([zl_s, zl_t])

    kernel = functools.partial(
        _jmmd_linear_kernel,
        alphas_per_layer=LAYER_ALPHAS,
        batch_size=batch_size,
    )
    out = pl.pallas_call(
        kernel,
        out_shape=jax.ShapeDtypeStruct((1,), jnp.float32),
        in_specs=[pl.BlockSpec(memory_space=pltpu.MemorySpace.VMEM)] * len(flat_inputs),
        out_specs=pl.BlockSpec(memory_space=pltpu.MemorySpace.SMEM),
    )(*flat_inputs)
    return out[0]


def jmmd_loss_ref(z_s, z_t):
    """Pure-JAX dense reference mirroring the PyTorch forward (for validation)."""
    batch_size = z_s[0].shape[0]
    idx = _build_index_matrix(batch_size, LINEAR)
    kernel_matrix = jnp.ones_like(idx)
    for zl_s, zl_t, alphas in zip(z_s, z_t, LAYER_ALPHAS):
        x = jnp.concatenate([zl_s, zl_t], axis=0)
        d2 = jnp.sum((x[:, None, :] - x[None, :, :]) ** 2, axis=-1)
        layer_k = sum(jnp.exp(-d2 / (2.0 * a * jnp.mean(d2))) for a in alphas)
        kernel_matrix = kernel_matrix * layer_k
    return jnp.sum(kernel_matrix * idx) + 2.0 / float(batch_size - 1)


if __name__ == "__main__":
    key = jax.random.PRNGKey(0)
    k1, k2, k3, k4 = jax.random.split(key, 4)
    B, D1, D2 = 8, 32, 16
    z1_s = jax.random.normal(k1, (B, D1), dtype=jnp.float32)
    z1_t = jax.random.normal(k2, (B, D1), dtype=jnp.float32)
    z2_s = jax.random.normal(k3, (B, D2), dtype=jnp.float32)
    z2_t = jax.random.normal(k4, (B, D2), dtype=jnp.float32)

    loss = jmmd_loss((z1_s, z2_s), (z1_t, z2_t))
    loss = jax.block_until_ready(loss)

    ref = jax.block_until_ready(jmmd_loss_ref((z1_s, z2_s), (z1_t, z2_t)))
    assert np.allclose(np.asarray(loss), np.asarray(ref), rtol=1e-4, atol=1e-5), (loss, ref)

    print("KERNEL_OK")
</pallas_src>

<mosaic_0001>
module attributes {stable_mosaic.version = 11 : i64} {
  func.func @_jmmd_linear_kernel(%arg0: memref<8x32xf32, #tpu.memory_space<vmem>>, %arg1: memref<8x32xf32, #tpu.memory_space<vmem>>, %arg2: memref<8x16xf32, #tpu.memory_space<vmem>>, %arg3: memref<8x16xf32, #tpu.memory_space<vmem>>, %arg4: memref<1xf32, #tpu.memory_space<smem>>) attributes {dimension_semantics = [], scalar_prefetch = 0 : i64, scratch_operands = 0 : i64, tpu.core_type = #tpu.core_type<tc>} {
    %c0 = arith.constant 0 : index
    %c0_0 = arith.constant 0 : index
    %0 = vector.load %arg0[%c0, %c0_0] : memref<8x32xf32, #tpu.memory_space<vmem>>, vector<8x32xf32>
    %c0_1 = arith.constant 0 : index
    %c0_2 = arith.constant 0 : index
    %1 = vector.load %arg1[%c0_1, %c0_2] : memref<8x32xf32, #tpu.memory_space<vmem>>, vector<8x32xf32>
    %cst = arith.constant dense<0.000000e+00> : vector<32xf32>
    %2 = vector.multi_reduction <add>, %0, %cst [0] : vector<8x32xf32> to vector<32xf32>
    %3 = vector.shape_cast %2 : vector<32xf32> to vector<1x32xf32>
    %cst_3 = arith.constant dense<0.000000e+00> : vector<32xf32>
    %4 = vector.multi_reduction <add>, %1, %cst_3 [0] : vector<8x32xf32> to vector<32xf32>
    %5 = vector.shape_cast %4 : vector<32xf32> to vector<1x32xf32>
    %6 = arith.addf %3, %5 : vector<1x32xf32>
    %cst_4 = arith.constant 6.250000e-02 : f32
    %7 = vector.broadcast %cst_4 : f32 to vector<1x32xf32>
    %8 = arith.mulf %6, %7 : vector<1x32xf32>
    %9 = vector.broadcast %8 : vector<1x32xf32> to vector<8x32xf32>
    %10 = arith.subf %0, %9 : vector<8x32xf32>
    %11 = vector.broadcast %8 : vector<1x32xf32> to vector<8x32xf32>
    %12 = arith.subf %1, %11 : vector<8x32xf32>
    %13 = arith.mulf %10, %10 : vector<8x32xf32>
    %cst_5 = arith.constant dense<0.000000e+00> : vector<8xf32>
    %14 = vector.multi_reduction <add>, %13, %cst_5 [1] : vector<8x32xf32> to vector<8xf32>
    %15 = vector.shape_cast %14 : vector<8xf32> to vector<8x1xf32>
    %16 = arith.mulf %12, %12 : vector<8x32xf32>
    %cst_6 = arith.constant dense<0.000000e+00> : vector<8xf32>
    %17 = vector.multi_reduction <add>, %16, %cst_6 [1] : vector<8x32xf32> to vector<8xf32>
    %18 = vector.shape_cast %17 : vector<8xf32> to vector<8x1xf32>
    %19 = vector.shape_cast %15 : vector<8x1xf32> to vector<1x8x1xf32>
    %cst_7 = arith.constant dense<0.000000e+00> : vector<1xf32>
    %20 = vector.multi_reduction <add>, %19, %cst_7 [1, 2] : vector<1x8x1xf32> to vector<1xf32>
    %21 = vector.shape_cast %20 : vector<1xf32> to vector<1x1x1xf32>
    %22 = vector.extract %21[0, 0, 0] : f32 from vector<1x1x1xf32>
    %23 = vector.shape_cast %18 : vector<8x1xf32> to vector<1x8x1xf32>
    %cst_8 = arith.constant dense<0.000000e+00> : vector<1xf32>
    %24 = vector.multi_reduction <add>, %23, %cst_8 [1, 2] : vector<1x8x1xf32> to vector<1xf32>
    %25 = vector.shape_cast %24 : vector<1xf32> to vector<1x1x1xf32>
    %26 = vector.extract %25[0, 0, 0] : f32 from vector<1x1x1xf32>
    %27 = arith.addf %22, %26 : f32
    %cst_9 = arith.constant 8.000000e+00 : f32
    %28 = arith.divf %27, %cst_9 : f32
    %cst_10 = arith.constant 0.000000e+00 : f32
    %29 = arith.cmpf ogt, %28, %cst_10 : f32
    %cst_11 = arith.constant 1.000000e+00 : f32
    %30 = arith.select %29, %28, %cst_11 : f32
    %cst_12 = arith.constant 1.000000e+00 : f32
    %31 = arith.divf %cst_12, %30 : f32
    %c7_i32 = arith.constant 7 : i32
    %32 = tpu.dynamic_rotate %10 by %c7_i32 dim 0 : vector<8x32xf32>, i32 -> vector<8x32xf32>
    %c7_i32_13 = arith.constant 7 : i32
    %33 = tpu.dynamic_rotate %12 by %c7_i32_13 dim 0 : vector<8x32xf32>, i32 -> vector<8x32xf32>
    %c7_i32_14 = arith.constant 7 : i32
    %34 = tpu.dynamic_rotate %15 by %c7_i32_14 dim 0 : vector<8x1xf32>, i32 -> vector<8x1xf32>
    %c7_i32_15 = arith.constant 7 : i32
    %35 = tpu.dynamic_rotate %18 by %c7_i32_15 dim 0 : vector<8x1xf32>, i32 -> vector<8x1xf32>
    %36 = arith.mulf %10, %32 : vector<8x32xf32>
    %cst_16 = arith.constant dense<0.000000e+00> : vector<8xf32>
    %37 = vector.multi_reduction <add>, %36, %cst_16 [1] : vector<8x32xf32> to vector<8xf32>
    %38 = vector.shape_cast %37 : vector<8xf32> to vector<8x1xf32>
    %39 = arith.mulf %12, %33 : vector<8x32xf32>
    %cst_17 = arith.constant dense<0.000000e+00> : vector<8xf32>
    %40 = vector.multi_reduction <add>, %39, %cst_17 [1] : vector<8x32xf32> to vector<8xf32>
    %41 = vector.shape_cast %40 : vector<8xf32> to vector<8x1xf32>
    %42 = arith.mulf %10, %33 : vector<8x32xf32>
    %cst_18 = arith.constant dense<0.000000e+00> : vector<8xf32>
    %43 = vector.multi_reduction <add>, %42, %cst_18 [1] : vector<8x32xf32> to vector<8xf32>
    %44 = vector.shape_cast %43 : vector<8xf32> to vector<8x1xf32>
    %45 = arith.mulf %12, %32 : vector<8x32xf32>
    %cst_19 = arith.constant dense<0.000000e+00> : vector<8xf32>
    %46 = vector.multi_reduction <add>, %45, %cst_19 [1] : vector<8x32xf32> to vector<8xf32>
    %47 = vector.shape_cast %46 : vector<8xf32> to vector<8x1xf32>
    %48 = arith.addf %15, %34 : vector<8x1xf32>
    %cst_20 = arith.constant 2.000000e+00 : f32
    %49 = vector.broadcast %cst_20 : f32 to vector<8x1xf32>
    %50 = arith.mulf %49, %38 : vector<8x1xf32>
    %51 = arith.subf %48, %50 : vector<8x1xf32>
    %52 = arith.addf %18, %35 : vector<8x1xf32>
    %cst_21 = arith.constant 2.000000e+00 : f32
    %53 = vector.broadcast %cst_21 : f32 to vector<8x1xf32>
    %54 = arith.mulf %53, %41 : vector<8x1xf32>
    %55 = arith.subf %52, %54 : vector<8x1xf32>
    %56 = arith.addf %15, %35 : vector<8x1xf32>
    %cst_22 = arith.constant 2.000000e+00 : f32
    %57 = vector.broadcast %cst_22 : f32 to vector<8x1xf32>
    %58 = arith.mulf %57, %44 : vector<8x1xf32>
    %59 = arith.subf %56, %58 : vector<8x1xf32>
    %60 = arith.addf %18, %34 : vector<8x1xf32>
    %cst_23 = arith.constant 2.000000e+00 : f32
    %61 = vector.broadcast %cst_23 : f32 to vector<8x1xf32>
    %62 = arith.mulf %61, %47 : vector<8x1xf32>
    %63 = arith.subf %60, %62 : vector<8x1xf32>
    %64 = tpu.concatenate %51, %55, %59, %63 in 1 : vector<8x1xf32>, vector<8x1xf32>, vector<8x1xf32>, vector<8x1xf32> -> vector<8x4xf32>
    %cst_24 = arith.constant 0.000000e+00 : f32
    %65 = vector.broadcast %cst_24 : f32 to vector<8x4xf32>
    %66 = arith.maximumf %64, %65 : vector<8x4xf32>
    %cst_25 = arith.constant 0.000000e+00 : f32
    %67 = vector.broadcast %cst_25 : f32 to vector<8x4xf32>
    %cst_26 = arith.constant -1.000000e+00 : f32
    %68 = arith.mulf %cst_26, %31 : f32
    %69 = vector.broadcast %68 : f32 to vector<8x4xf32>
    %70 = arith.mulf %66, %69 : vector<8x4xf32>
    %71 = math.exp %70 : vector<8x4xf32>
    %72 = arith.addf %67, %71 : vector<8x4xf32>
    %cst_27 = arith.constant -5.000000e-01 : f32
    %73 = arith.mulf %cst_27, %31 : f32
    %74 = vector.broadcast %73 : f32 to vector<8x4xf32>
    %75 = arith.mulf %66, %74 : vector<8x4xf32>
    %76 = math.exp %75 : vector<8x4xf32>
    %77 = arith.addf %72, %76 : vector<8x4xf32>
    %cst_28 = arith.constant -2.500000e-01 : f32
    %78 = arith.mulf %cst_28, %31 : f32
    %79 = vector.broadcast %78 : f32 to vector<8x4xf32>
    %80 = arith.mulf %66, %79 : vector<8x4xf32>
    %81 = math.exp %80 : vector<8x4xf32>
    %82 = arith.addf %77, %81 : vector<8x4xf32>
    %c0_29 = arith.constant 0 : index
    %c0_30 = arith.constant 0 : index
    %83 = vector.load %arg2[%c0_29, %c0_30] : memref<8x16xf32, #tpu.memory_space<vmem>>, vector<8x16xf32>
    %c0_31 = arith.constant 0 : index
    %c0_32 = arith.constant 0 : index
    %84 = vector.load %arg3[%c0_31, %c0_32] : memref<8x16xf32, #tpu.memory_space<vmem>>, vector<8x16xf32>
    %cst_33 = arith.constant dense<0.000000e+00> : vector<16xf32>
    %85 = vector.multi_reduction <add>, %83, %cst_33 [0] : vector<8x16xf32> to vector<16xf32>
    %86 = vector.shape_cast %85 : vector<16xf32> to vector<1x16xf32>
    %cst_34 = arith.constant dense<0.000000e+00> : vector<16xf32>
    %87 = vector.multi_reduction <add>, %84, %cst_34 [0] : vector<8x16xf32> to vector<16xf32>
    %88 = vector.shape_cast %87 : vector<16xf32> to vector<1x16xf32>
    %89 = arith.addf %86, %88 : vector<1x16xf32>
    %cst_35 = arith.constant 6.250000e-02 : f32
    %90 = vector.broadcast %cst_35 : f32 to vector<1x16xf32>
    %91 = arith.mulf %89, %90 : vector<1x16xf32>
    %92 = vector.broadcast %91 : vector<1x16xf32> to vector<8x16xf32>
    %93 = arith.subf %83, %92 : vector<8x16xf32>
    %94 = vector.broadcast %91 : vector<1x16xf32> to vector<8x16xf32>
    %95 = arith.subf %84, %94 : vector<8x16xf32>
    %96 = arith.mulf %93, %93 : vector<8x16xf32>
    %cst_36 = arith.constant dense<0.000000e+00> : vector<8xf32>
    %97 = vector.multi_reduction <add>, %96, %cst_36 [1] : vector<8x16xf32> to vector<8xf32>
    %98 = vector.shape_cast %97 : vector<8xf32> to vector<8x1xf32>
    %99 = arith.mulf %95, %95 : vector<8x16xf32>
    %cst_37 = arith.constant dense<0.000000e+00> : vector<8xf32>
    %100 = vector.multi_reduction <add>, %99, %cst_37 [1] : vector<8x16xf32> to vector<8xf32>
    %101 = vector.shape_cast %100 : vector<8xf32> to vector<8x1xf32>
    %102 = vector.shape_cast %98 : vector<8x1xf32> to vector<1x8x1xf32>
    %cst_38 = arith.constant dense<0.000000e+00> : vector<1xf32>
    %103 = vector.multi_reduction <add>, %102, %cst_38 [1, 2] : vector<1x8x1xf32> to vector<1xf32>
    %104 = vector.shape_cast %103 : vector<1xf32> to vector<1x1x1xf32>
    %105 = vector.extract %104[0, 0, 0] : f32 from vector<1x1x1xf32>
    %106 = vector.shape_cast %101 : vector<8x1xf32> to vector<1x8x1xf32>
    %cst_39 = arith.constant dense<0.000000e+00> : vector<1xf32>
    %107 = vector.multi_reduction <add>, %106, %cst_39 [1, 2] : vector<1x8x1xf32> to vector<1xf32>
    %108 = vector.shape_cast %107 : vector<1xf32> to vector<1x1x1xf32>
    %109 = vector.extract %108[0, 0, 0] : f32 from vector<1x1x1xf32>
    %110 = arith.addf %105, %109 : f32
    %cst_40 = arith.constant 8.000000e+00 : f32
    %111 = arith.divf %110, %cst_40 : f32
    %cst_41 = arith.constant 0.000000e+00 : f32
    %112 = arith.cmpf ogt, %111, %cst_41 : f32
    %cst_42 = arith.constant 1.000000e+00 : f32
    %113 = arith.select %112, %111, %cst_42 : f32
    %cst_43 = arith.constant 1.000000e+00 : f32
    %114 = arith.divf %cst_43, %113 : f32
    %c7_i32_44 = arith.constant 7 : i32
    %115 = tpu.dynamic_rotate %93 by %c7_i32_44 dim 0 : vector<8x16xf32>, i32 -> vector<8x16xf32>
    %c7_i32_45 = arith.constant 7 : i32
    %116 = tpu.dynamic_rotate %95 by %c7_i32_45 dim 0 : vector<8x16xf32>, i32 -> vector<8x16xf32>
    %c7_i32_46 = arith.constant 7 : i32
    %117 = tpu.dynamic_rotate %98 by %c7_i32_46 dim 0 : vector<8x1xf32>, i32 -> vector<8x1xf32>
    %c7_i32_47 = arith.constant 7 : i32
    %118 = tpu.dynamic_rotate %101 by %c7_i32_47 dim 0 : vector<8x1xf32>, i32 -> vector<8x1xf32>
    %119 = arith.mulf %93, %115 : vector<8x16xf32>
    %cst_48 = arith.constant dense<0.000000e+00> : vector<8xf32>
    %120 = vector.multi_reduction <add>, %119, %cst_48 [1] : vector<8x16xf32> to vector<8xf32>
    %121 = vector.shape_cast %120 : vector<8xf32> to vector<8x1xf32>
    %122 = arith.mulf %95, %116 : vector<8x16xf32>
    %cst_49 = arith.constant dense<0.000000e+00> : vector<8xf32>
    %123 = vector.multi_reduction <add>, %122, %cst_49 [1] : vector<8x16xf32> to vector<8xf32>
    %124 = vector.shape_cast %123 : vector<8xf32> to vector<8x1xf32>
    %125 = arith.mulf %93, %116 : vector<8x16xf32>
    %cst_50 = arith.constant dense<0.000000e+00> : vector<8xf32>
    %126 = vector.multi_reduction <add>, %125, %cst_50 [1] : vector<8x16xf32> to vector<8xf32>
    %127 = vector.shape_cast %126 : vector<8xf32> to vector<8x1xf32>
    %128 = arith.mulf %95, %115 : vector<8x16xf32>
    %cst_51 = arith.constant dense<0.000000e+00> : vector<8xf32>
    %129 = vector.multi_reduction <add>, %128, %cst_51 [1] : vector<8x16xf32> to vector<8xf32>
    %130 = vector.shape_cast %129 : vector<8xf32> to vector<8x1xf32>
    %131 = arith.addf %98, %117 : vector<8x1xf32>
    %cst_52 = arith.constant 2.000000e+00 : f32
    %132 = vector.broadcast %cst_52 : f32 to vector<8x1xf32>
    %133 = arith.mulf %132, %121 : vector<8x1xf32>
    %134 = arith.subf %131, %133 : vector<8x1xf32>
    %135 = arith.addf %101, %118 : vector<8x1xf32>
    %cst_53 = arith.constant 2.000000e+00 : f32
    %136 = vector.broadcast %cst_53 : f32 to vector<8x1xf32>
    %137 = arith.mulf %136, %124 : vector<8x1xf32>
    %138 = arith.subf %135, %137 : vector<8x1xf32>
    %139 = arith.addf %98, %118 : vector<8x1xf32>
    %cst_54 = arith.constant 2.000000e+00 : f32
    %140 = vector.broadcast %cst_54 : f32 to vector<8x1xf32>
    %141 = arith.mulf %140, %127 : vector<8x1xf32>
    %142 = arith.subf %139, %141 : vector<8x1xf32>
    %143 = arith.addf %101, %117 : vector<8x1xf32>
    %cst_55 = arith.constant 2.000000e+00 : f32
    %144 = vector.broadcast %cst_55 : f32 to vector<8x1xf32>
    %145 = arith.mulf %144, %130 : vector<8x1xf32>
    %146 = arith.subf %143, %145 : vector<8x1xf32>
    %147 = tpu.concatenate %134, %138, %142, %146 in 1 : vector<8x1xf32>, vector<8x1xf32>, vector<8x1xf32>, vector<8x1xf32> -> vector<8x4xf32>
    %cst_56 = arith.constant 0.000000e+00 : f32
    %148 = vector.broadcast %cst_56 : f32 to vector<8x4xf32>
    %149 = arith.maximumf %147, %148 : vector<8x4xf32>
    %cst_57 = arith.constant 0.000000e+00 : f32
    %150 = vector.broadcast %cst_57 : f32 to vector<8x4xf32>
    %cst_58 = arith.constant -0.333333343 : f32
    %151 = arith.mulf %cst_58, %114 : f32
    %152 = vector.broadcast %151 : f32 to vector<8x4xf32>
    %153 = arith.mulf %149, %152 : vector<8x4xf32>
    %154 = math.exp %153 : vector<8x4xf32>
    %155 = arith.addf %150, %154 : vector<8x4xf32>
    %156 = arith.mulf %82, %155 : vector<8x4xf32>
    %157 = tpu.iota {dimensions = array<i32: 1>} : vector<8x4xi32>
    %c2_i32 = arith.constant 2 : i32
    %158 = vector.broadcast %c2_i32 : i32 to vector<8x4xi32>
    %159 = arith.cmpi slt, %157, %158 : vector<8x4xi32>
    %cst_59 = arith.constant 0.000000e+00 : f32
    %160 = vector.broadcast %cst_59 : f32 to vector<8x4xf32>
    %161 = arith.subf %160, %156 : vector<8x4xf32>
    %162 = arith.select %159, %156, %161 : vector<8x4xi1>, vector<8x4xf32>
    %163 = vector.shape_cast %162 : vector<8x4xf32> to vector<1x8x4xf32>
    %cst_60 = arith.constant dense<0.000000e+00> : vector<1xf32>
    %164 = vector.multi_reduction <add>, %163, %cst_60 [1, 2] : vector<1x8x4xf32> to vector<1xf32>
    %165 = vector.shape_cast %164 : vector<1xf32> to vector<1x1x1xf32>
    %166 = vector.extract %165[0, 0, 0] : f32 from vector<1x1x1xf32>
    %cst_61 = arith.constant 8.000000e+00 : f32
    %167 = arith.divf %166, %cst_61 : f32
    %cst_62 = arith.constant 0.285714298 : f32
    %168 = arith.addf %167, %cst_62 : f32
    %c0_63 = arith.constant 0 : index
    %169 = memref.load %arg4[%c0_63] : memref<1xf32, #tpu.memory_space<smem>>
    memref.store %168, %arg4[%c0_63] : memref<1xf32, #tpu.memory_space<smem>>
    return
  }
}

</mosaic_0001>

<bundles_post_ra>
// kernel: tpu_custom_call.1
= control target key start
LH: loop header
LB: loop body
LE: loop exit
PB: predicated region body
PF: predicated region fallthrough
CT: control target
= control target key end

     0   :  { %9 = vsyncpa [#allocation3], 0  ;;  %s570_s0 = inlined_call_operand.hbm [shape: f32[8,32], index: 0, kind: input, shape index: {}]   ;;  %s571_s1 = inlined_call_operand.hbm [shape: f32[8,32], index: 1, kind: input, shape index: {}]   ;;  %s572_s2 = inlined_call_operand.hbm [shape: f32[8,16], index: 2, kind: input, shape index: {}]   ;;  %s573_s3 = inlined_call_operand.vmem [shape: f32[8,16], index: 3, kind: input, shape index: {}]   ;;  %s574_s4 = inlined_call_operand.hbm [shape: f32[1], index: 4, kind: output, shape index: {}]  }
   0x1   :  { %10 = vsyncpa [#allocation6], 0 }
   0x2   :  { %11 = vsyncpa [#allocation4], 0  ;;  %s445_s15 = smov [#allocation5]   ;;  %s446_s17 = smov [#allocation2]  }
   0x3   :  { %s28_s16 = sshll.u32 %s445_s15, 4  ;;  %s18_s18 = sshll.u32 %s446_s17, 4  ;;  %s29_s16 = int_to_ptr.vmem [resolvable:$true] %s28_s16  ;;  %s19_s18 = int_to_ptr.vmem [resolvable:$true] %s18_s18 }
   0x4   :  { %s363_s21 = scalar_lea.hbm %s571_s1, 128 }
   0x5   :  { %p364_p0 = scmp.ne.s32.totalorder %s571_s1, %s363_s21  ;;  %p367_p1 = scmp.lt.u32.totalorder %s363_s21, %s571_s1 }
   0x7   :  { %p369_p2 = pnand %p367_p1, %p364_p0 }
   0x9   :  { %372 = shalt.err (!%p369_p2)
}
   0xa   :  { %s373_s26 = scalar_lea.vmem %s29_s16, 128  ;;  %p378_p4 = scmp.lt.s32.totalorder %s29_s16, %s29_s16 }
   0xb   :  { %p374_p3 = scmp.ne.s32.totalorder %s29_s16, %s373_s26  ;;  %p379_p5 = scmp.lt.s32.totalorder %s373_s26, %s373_s26 }
   0xd   :  { %p380_p6 = por %p379_p5, %p378_p4 }
   0xf   :  { %p381_p7 = pnand %p380_p6, %p374_p3 }
  0x11   :  { %384 = shalt.err (!%p381_p7)
}
  0x12   :  { %31 = dma.hbm_to_vmem [thread:$0]  %s571_s1, 128, %s29_s16, [#allocation6]  }
  0x13   :  { %s385_s5 = scalar_lea.hbm %s570_s0, 128 }
  0x14   :  { %p386_p8 = scmp.ne.s32.totalorder %s570_s0, %s385_s5  ;;  %p389_p9 = scmp.lt.u32.totalorder %s385_s5, %s570_s0 }
  0x16   :  { %p391_p10 = pnand %p389_p9, %p386_p8 }
  0x18   :  { %394 = shalt.err (!%p391_p10)
}
  0x19   :  { %s395_s10 = scalar_lea.vmem %s19_s18, 128  ;;  %p400_p12 = scmp.lt.s32.totalorder %s19_s18, %s19_s18 }
  0x1a   :  { %p396_p11 = scmp.ne.s32.totalorder %s19_s18, %s395_s10  ;;  %p401_p13 = scmp.lt.s32.totalorder %s395_s10, %s395_s10 }
  0x1c   :  { %p402_p0 = por %p401_p13, %p400_p12 }
  0x1e   :  { %p403_p1 = pnand %p402_p0, %p396_p11 }
  0x20   :  { %406 = shalt.err (!%p403_p1)
}
  0x21   :  { %21 = dma.hbm_to_vmem [thread:$0]  %s570_s0, 128, %s19_s18, [#allocation3]  }
  0x22   :  { %s447_s12 = smov [#allocation7]   ;;  %s407_s16 = scalar_lea.hbm %s572_s2, 128 }
  0x23   :  { %s38_s13 = sshll.u32 %s447_s12, 4  ;;  %p408_p2 = scmp.ne.s32.totalorder %s572_s2, %s407_s16  ;;  %s39_s13 = int_to_ptr.vmem [resolvable:$true] %s38_s13 }
  0x24   :  { %p411_p3 = scmp.lt.u32.totalorder %s407_s16, %s572_s2 }
  0x26   :  { %p413_p4 = pnand %p411_p3, %p408_p2 }
  0x28   :  { %416 = shalt.err (!%p413_p4)
}
  0x29   :  { %s417_s22 = scalar_lea.vmem %s39_s13, 128  ;;  %p422_p6 = scmp.lt.s32.totalorder %s39_s13, %s39_s13 }
  0x2a   :  { %p418_p5 = scmp.ne.s32.totalorder %s39_s13, %s417_s22  ;;  %p423_p7 = scmp.lt.s32.totalorder %s417_s22, %s417_s22 }
  0x2c   :  { %p424_p8 = por %p423_p7, %p422_p6 }
  0x2e   :  { %p425_p9 = pnand %p424_p8, %p418_p5 }
  0x30   :  { %428 = shalt.err (!%p425_p9)
}
  0x31   :  { %41 = dma.hbm_to_vmem [thread:$0]  %s572_s2, 128, %s39_s13, [#allocation6]  }
  0x32   :  { %439 = dma.done.wait [#allocation3], 128  }
  0x33   :  { %440 = vsyncadd [#allocation3], 4294967168 }
  0x34   :  { %441 = dma.done.wait [#allocation6], 256  }
  0x35   :  { %442 = vsyncadd [#allocation6], 4294967040  ;;  %vm55_vm0 = vcmask 261120   ;;  %vm182_vm1 = vcmask 130048   ;;  %v53_v0 = vld [vmem:[#allocation2] sm:$0xff]  ;;  %v54_v1 = vld [vmem:[#allocation5] sm:$0xff] }
  0x36   :  { %v180_v2 = vld [vmem:[#allocation7] sm:$0xff]  ;;  %v56_v3 = vsel %vm55_vm0, %v53_v0, 0.0  ;;  %v63_v4 = vsel %vm55_vm0, %v54_v1, 0.0  ;;  %v181_v5 = vld [vmem:[%s573_s3] sm:$0xff]  ;;  %vm82_vm2 = vcmask 7168   ;;  %s448_s2 = smov 1  }
  0x37   :  { %v183_v6 = vsel %vm182_vm1, %v180_v2, 0.0  ;;  %v57_v7 = vrot.slane %v56_v3, 4  ;;  %v64_v8 = vrot.slane %v63_v4, 4  ;;  %v190_v10 = vsel %vm182_vm1, %v181_v5, 0.0  ;;  %s449_s3 = smov 2   ;;  %s450_s25 = smov 3  }
  0x38   :  { %v184_v9 = vrot.slane %v183_v6, 4  ;;  %v191_v11 = vrot.slane %v190_v10, 4  ;;  %vm157_vm3 = vcmask 15360   ;;  %vm159_vm4 = vcmask 23552   ;;  %s429_s19 = scalar_lea.hbm %s574_s4, 16 }
  0x39   :  { %v58_v12 = vadd.f32 %v57_v7, %v56_v3  ;;  %v65_v13 = vadd.f32 %v64_v8, %v63_v4  ;;  %vm298_vm6 = vcmask 31744   ;;  %p430_p12 = scmp.ne.s32.totalorder %s574_s4, %s429_s19  ;;  %p433_p13 = scmp.lt.u32.totalorder %s429_s19, %s574_s4 }
  0x3a   :  { %v185_v14 = vadd.f32 %v184_v9, %v183_v6  ;;  %v192_v15 = vadd.f32 %v191_v11, %v190_v10 }
  0x3b   :  { %v59_v16 = vrot.slane %v58_v12, 2  ;;  %v66_v17 = vrot.slane %v65_v13, 2  ;;  %p435_p0 = pnand %p433_p13, %p430_p12 }
  0x3c   :  { %v186_v18 = vrot.slane %v185_v14, 2  ;;  %v193_v19 = vrot.slane %v192_v15, 2 }
  0x3d   :  { %v60_v20 = vadd.f32 %v59_v16, %v58_v12  ;;  %v67_v21 = vadd.f32 %v66_v17, %v65_v13 }
  0x3e   :  { %v187_v22 = vadd.f32 %v186_v18, %v185_v14  ;;  %v194_v23 = vadd.f32 %v193_v19, %v192_v15 }
  0x3f   :  { %v61_v24 = vrot.slane %v60_v20, 1  ;;  %v68_v25 = vrot.slane %v67_v21, 1 }
  0x40   :  { %v188_v26 = vrot.slane %v187_v22, 1  ;;  %v195_v27 = vrot.slane %v194_v23, 1 }
  0x41   :  { %v62_v28 = vadd.f32 %v61_v24, %v60_v20  ;;  %v69_v29 = vadd.f32 %v68_v25, %v67_v21 }
  0x42   :  { %v189_v30 = vadd.f32 %v188_v26, %v187_v22  ;;  %v196_v31 = vadd.f32 %v195_v27, %v194_v23 }
  0x43   :  { %v70_v32 = vadd.f32 %v69_v29, %v62_v28 }
  0x44   :  { %v197_v33 = vadd.f32 %v196_v31, %v189_v30 }
  0x45   :  { %v71_v34 = vmul.f32 0.0625, %v70_v32 }
  0x46   :  { %v198_v35 = vmul.f32 0.0625, %v197_v33 }
  0x47   :  { %v72_v36 = vsub.f32 %v53_v0, %v71_v34  ;;  %v73_v37 = vsub.f32 %v54_v1, %v71_v34 }
  0x48   :  { %v199_v38 = vsub.f32 %v180_v2, %v198_v35  ;;  %v200_v39 = vsub.f32 %v181_v5, %v198_v35 }
  0x49   :  { %v74_v40 = vmul.f32 %v72_v36, %v72_v36  ;;  %v78_v41 = vmul.f32 %v73_v37, %v73_v37  ;;  %v113_v48 = vrot.slane %v73_v37, 1  ;;  %v112_v51 = vrot.slane %v72_v36, 1 }
  0x4a   :  { %v201_v42 = vmul.f32 %v199_v38, %v199_v38  ;;  %v205_v43 = vmul.f32 %v200_v39, %v200_v39  ;;  %v239_v56 = vrot.slane %v200_v39, 1  ;;  %v238_v61 = vrot.slane %v199_v38, 1 }
  0x4b   :  { %v75_v44 = vsel %vm55_vm0, %v74_v40, 0.0  ;;  %v79_v46 = vsel %vm55_vm0, %v78_v41, 0.0  ;;  %v120_v49 = vmul.f32 %v113_v48, %v73_v37  ;;  %v128_v52 = vmul.f32 %v112_v51, %v73_v37 }
  0x4c   :  { %76 = vadd.xlane.f32.xlu0 %v75_v44  ;;  %v202_v45 = vsel %vm182_vm1, %v201_v42, 0.0  ;;  %v206_v47 = vsel %vm182_vm1, %v205_v43, 0.0  ;;  %v124_v53 = vmul.f32 %v113_v48, %v72_v36  ;;  %v250_v57 = vmul.f32 %v239_v56, %v199_v38 }
  0x4d   :  { %203 = vadd.xlane.f32.xlu1 %v202_v45  ;;  %v121_v50 = vsel %vm55_vm0, %v120_v49, 0.0  ;;  %v129_v54 = vsel %vm55_vm0, %v128_v52, 0.0  ;;  %v246_v58 = vmul.f32 %v239_v56, %v200_v39  ;;  %v116_v62 = vmul.f32 %v112_v51, %v72_v36 }
  0x4e   :  { %v125_v55 = vsel %vm55_vm0, %v124_v53, 0.0  ;;  %v251_v59 = vsel %vm182_vm1, %v250_v57, 0.0  ;;  %v254_v63 = vmul.f32 %v238_v61, %v200_v39  ;;  %v242_v2 = vmul.f32 %v238_v61, %v199_v38 }
  0x4f   :  { %v247_v60 = vsel %vm182_vm1, %v246_v58, 0.0  ;;  %v117_v0 = vsel %vm55_vm0, %v116_v62, 0.0 }
  0x50   :  { %80 = vadd.xlane.f32.xlu0 %v79_v46  ;;  %v255_v1 = vsel %vm182_vm1, %v254_v63, 0.0  ;;  %v243_v3 = vsel %vm182_vm1, %v242_v2, 0.0 }
  0x51   :  { %207 = vadd.xlane.f32.xlu1 %v206_v47 }
  0xd9   :  { %v77_v4 = vpop.xlane.xlu0 %76 }
  0xda   :  { %v114_v5 = vrot.slane %v77_v4, 1  ;;  %v83_v6 = vsel %vm82_vm2, %v77_v4, 0.0  ;;  %v533_v7 = vpop.xlane.xlu1 %203 }
  0xdb   :  { %84 = vadd.xlane.f32.xlu0 %v83_v6  ;;  %v240_v8 = vrot.slane %v533_v7, 1  ;;  %v209_v9 = vsel %vm82_vm2, %v533_v7, 0.0 }
  0xdc   :  { %v538_v10 = vadd.f32 %v114_v5, %v77_v4 }
  0xdd   :  { %v81_v11 = vpop.xlane.xlu0 %80  ;;  %v543_v12 = vadd.f32 %v240_v8, %v533_v7 }
  0xde   :  { %v93_v13 = vsel %vm82_vm2, %v81_v11, 0.0  ;;  %v208_v14 = vpop.xlane.xlu1 %207  ;;  %v115_v21 = vrot.slane %v81_v11, 1  ;;  %v141_v46 = vadd.f32 %v114_v5, %v81_v11 }
  0xdf   :  { %210 = vadd.xlane.f32.xlu0 %v209_v9  ;;  %94 = vadd.xlane.f32.xlu1 %v93_v13  ;;  %v219_v15 = vsel %vm82_vm2, %v208_v14, 0.0  ;;  %v241_v37 = vrot.slane %v208_v14, 1  ;;  %v267_v56 = vadd.f32 %v240_v8, %v208_v14 }
  0xe0   :  { %v135_v29 = vadd.f32 %v115_v21, %v81_v11  ;;  %v138_v38 = vadd.f32 %v115_v21, %v77_v4 }
  0xe1   :  { %v264_v47 = vadd.f32 %v241_v37, %v533_v7  ;;  %v261_v53 = vadd.f32 %v241_v37, %v208_v14 }
  0xe3   :  { %122 = vadd.xlane.f32.xlu0 %v121_v50  ;;  %220 = vadd.xlane.f32.xlu1 %v219_v15 }
  0xe7   :  { %130 = vadd.xlane.f32.xlu0 %v129_v54  ;;  %126 = vadd.xlane.f32.xlu1 %v125_v55 }
  0xeb   :  { %252 = vadd.xlane.f32.xlu0 %v251_v59  ;;  %248 = vadd.xlane.f32.xlu1 %v247_v60 }
  0xef   :  { %118 = vadd.xlane.f32.xlu0 %v117_v0  ;;  %256 = vadd.xlane.f32.xlu1 %v255_v1 }
  0xf3   :  { %244 = vadd.xlane.f32.xlu1 %v243_v3 }
 0x168   :  { %v85_v16 = vpop.xlane.xlu0 %84 }
 0x169   :  { %v86_v17 = vrot.slane %v85_v16, 4 }
 0x16b   :  { %v87_v18 = vadd.f32 %v86_v17, %v85_v16 }
 0x16c   :  { %v95_v19 = vpop.xlane.xlu1 %94  ;;  %v211_v20 = vpop.xlane.xlu0 %210 }
 0x16d   :  { %v88_v22 = vrot.slane %v87_v18, 2  ;;  %v96_v23 = vrot.slane %v95_v19, 4  ;;  %v212_v58 = vrot.slane %v211_v20, 4 }
 0x16f   :  { %v97_v24 = vadd.f32 %v96_v23, %v95_v19  ;;  %v89_v25 = vadd.f32 %v88_v22, %v87_v18  ;;  %v213_v60 = vadd.f32 %v212_v58, %v211_v20 }
 0x170   :  { %v221_v26 = vpop.xlane.xlu1 %220  ;;  %v123_v27 = vpop.xlane.xlu0 %122 }
 0x171   :  { %v98_v28 = vrot.slane %v97_v24, 2  ;;  %v136_v30 = vmul.f32 2.0, %v123_v27  ;;  %v90_v31 = vrot.slane %v89_v25, 1  ;;  %v222_v59 = vrot.slane %v221_v26, 4 }
 0x172   :  { %v214_v62 = vrot.slane %v213_v60, 2 }
 0x173   :  { %v137_v32 = vsub.f32 %v135_v29, %v136_v30  ;;  %v99_v33 = vadd.f32 %v98_v28, %v97_v24  ;;  %v91_v36 = vadd.f32 %v90_v31, %v89_v25  ;;  %v223_v61 = vadd.f32 %v222_v59, %v221_v26 }
 0x174   :  { %v127_v34 = vpop.xlane.xlu1 %126  ;;  %v131_v35 = vpop.xlane.xlu0 %130  ;;  %v215_v1 = vadd.f32 %v214_v62, %v213_v60 }
 0x175   :  { %v139_v39 = vmul.f32 2.0, %v127_v34  ;;  %145 = vrot.lane.b32.xlu0 %v137_v32, %s448_s2  ;;  %v100_v40 = vrot.slane %v99_v33, 1  ;;  %330 = vpush %v91_v36  ;;  %v142_v42 = vmul.f32 2.0, %v131_v35  ;;  %v224_v63 = vrot.slane %v223_v61, 2 }
 0x176   :  { %v216_v3 = vrot.slane %v215_v1, 1 }
 0x177   :  { %v140_v41 = vsub.f32 %v138_v38, %v139_v39  ;;  %v101_v43 = vadd.f32 %v100_v40, %v99_v33  ;;  %v143_v49 = vsub.f32 %v141_v46, %v142_v42  ;;  %v225_v2 = vadd.f32 %v224_v63, %v223_v61 }
 0x178   :  { %v249_v44 = vpop.xlane.xlu1 %248  ;;  %v253_v45 = vpop.xlane.xlu0 %252  ;;  %v217_v6 = vadd.f32 %v216_v3, %v215_v1 }
 0x179   :  { %v265_v48 = vmul.f32 2.0, %v253_v45  ;;  %149 = vrot.lane.b32.xlu1 %v140_v41, %s449_s3  ;;  %332 = vpush %v101_v43  ;;  %v262_v50 = vmul.f32 2.0, %v249_v44  ;;  %v226_v4 = vrot.slane %v225_v2, 1 }
 0x17b   :  { %v266_v51 = vsub.f32 %v264_v47, %v265_v48  ;;  %v263_v54 = vsub.f32 %v261_v53, %v262_v50  ;;  %v227_v7 = vadd.f32 %v226_v4, %v225_v2  ;;  %v293_v48 = vlaneseq }
 0x17c   :  { %v257_v52 = vpop.xlane.xlu1 %256  ;;  %v119_v8 = vpop.xlane.xlu0 %118 }
 0x17d   :  { %153 = vrot.lane.b32.xlu1 %v143_v49, %s450_s25  ;;  %275 = vrot.lane.b32.xlu0 %v266_v51, %s449_s3  ;;  %v268_v55 = vmul.f32 2.0, %v257_v52  ;;  %v133_v11 = vmul.f32 2.0, %v119_v8  ;;  %v294_v49 = vand.u32 127, %v293_v48 }
 0x17f   :  { %v269_v57 = vsub.f32 %v267_v56, %v268_v55  ;;  %v134_v15 = vsub.f32 %v538_v10, %v133_v11  ;;  %vm295_vm5 = vcmp.lt.s32.totalorder %v294_v49, 2 }
 0x180   :  { %v245_v9 = vpop.xlane.xlu1 %244 }
 0x181   :  { %271 = vrot.lane.b32.xlu1 %v263_v54, %s448_s2  ;;  %v259_v36 = vmul.f32 2.0, %v245_v9 }
 0x183   :  { %v260_v38 = vsub.f32 %v543_v12, %v259_v36 }
 0x185   :  { %279 = vrot.lane.b32.xlu1 %v269_v57, %s450_s25 }
 0x1a6   :  { %s331_s26 = spop %330 }
 0x1aa   :  { %s333_s27 = spop %332 }
 0x1ab   :  { %s103_s28 = sadd.f32 %s333_s27, %s331_s26 }
 0x1ad   :  { %s106_s29 = smul.f32 0.125, %s103_s28 }
 0x1af   :  { %p107_p10 = scmp.gt.f32.partialorder %s106_s29, 0.0 }
 0x1b1   :  { %s576_s29 = smov (!%p107_p10, %s106_s29), 1.0 }
 0x1b2   :  { %v109_v0 = vstv %s576_s29 }
 0x1b3   :  { %351 = vrcp.f32 %v109_v0 }
 0x1bd   :  { %v352_v5 = vpop.eup %351 }
 0x1be   :  { %334 = vpush %v352_v5 }
 0x1bf   :  { %336 = vpush %v217_v6 }
 0x1c0   :  { %338 = vpush %v227_v7 }
 0x1e7   :  { %v146_v13 = vpop.permute.xlu0 %145 }
 0x1e8   :  { %v156_v16 = vsel %vm82_vm2, %v134_v15, %v146_v13 }
 0x1eb   :  { %v150_v14 = vpop.permute.xlu1 %149 }
 0x1ec   :  { %v158_v17 = vsel %vm157_vm3, %v156_v16, %v150_v14 }
 0x1ef   :  { %v154_v18 = vpop.permute.xlu1 %153  ;;  %s335_s30 = spop %334  ;;  %v276_v41 = vpop.permute.xlu0 %275 }
 0x1f0   :  { %v160_v19 = vsel %vm159_vm4, %v158_v17, %v154_v18  ;;  %s162_s5 = smul.f32 -1.0, %s335_s30  ;;  %s337_s6 = spop %336 }
 0x1f1   :  { %v161_v20 = vmax.f32 %v160_v19, 0.0  ;;  %s168_s7 = smul.f32 -0.5, %s335_s30  ;;  %s339_s8 = spop %338 }
 0x1f2   :  { %v163_v21 = vstv %s162_s5  ;;  %s174_s9 = smul.f32 -0.25, %s335_s30  ;;  %s229_s10 = sadd.f32 %s339_s8, %s337_s6 }
 0x1f3   :  { %v164_v22 = vmul.f32 %v163_v21, %v161_v20  ;;  %v169_v10 = vstv %s168_s7  ;;  %v272_v37 = vpop.permute.xlu1 %271 }
 0x1f4   :  { %v170_v23 = vmul.f32 %v169_v10, %v161_v20  ;;  %v175_v24 = vstv %s174_s9  ;;  %s232_s1 = smul.f32 0.125, %s229_s10  ;;  %v282_v39 = vsel %vm82_vm2, %v260_v38, %v272_v37 }
 0x1f5   :  { %v165_v25 = vmul.f32 1.442695, %v164_v22  ;;  %v176_v26 = vmul.f32 %v175_v24, %v161_v20  ;;  %v283_v42 = vsel %vm157_vm3, %v282_v39, %v276_v41 }
 0x1f6   :  { %v171_v27 = vmul.f32 1.442695, %v170_v23  ;;  %p233_p11 = scmp.gt.f32.partialorder %s232_s1, 0.0 }
 0x1f7   :  { %353 = vpow2.f32 %v165_v25  ;;  %v177_v28 = vmul.f32 1.442695, %v176_v26  ;;  %v280_v40 = vpop.permute.xlu1 %279 }
 0x1f8   :  { %355 = vpow2.f32 %v171_v27  ;;  %s578_s1 = smov (!%p233_p11, %s232_s1), 1.0  ;;  %v284_v43 = vsel %vm159_vm4, %v283_v42, %v280_v40 }
 0x1f9   :  { %357 = vpow2.f32 %v177_v28  ;;  %v235_v29 = vstv %s578_s1  ;;  %v285_v44 = vmax.f32 %v284_v43, 0.0 }
 0x1fa   :  { %359 = vrcp.f32 %v235_v29 }
 0x201   :  { %v354_v30 = vpop.eup %353 }
 0x202   :  { %v356_v31 = vpop.eup %355 }
 0x203   :  { %v173_v32 = vadd.f32 %v356_v31, %v354_v30  ;;  %v358_v33 = vpop.eup %357 }
 0x204   :  { %v360_v34 = vpop.eup %359 }
 0x205   :  { %v179_v35 = vadd.f32 %v358_v33, %v173_v32  ;;  %340 = vpush %v360_v34 }
 0x236   :  { %s341_s11 = spop %340 }
 0x237   :  { %s286_s12 = smul.f32 -0.33333334, %s341_s11 }
 0x239   :  { %v287_v45 = vstv %s286_s12 }
 0x23a   :  { %v288_v46 = vmul.f32 %v287_v45, %v285_v44 }
 0x23c   :  { %v289_v47 = vmul.f32 1.442695, %v288_v46 }
 0x23e   :  { %361 = vpow2.f32 %v289_v47 }
 0x248   :  { %v362_v50 = vpop.eup %361 }
 0x249   :  { %v292_v51 = vmul.f32 %v362_v50, %v179_v35 }
 0x24b   :  { %v296_v12 = vsub.f32 0.0, %v292_v51 }
 0x24d   :  { %v297_v52 = vsel %vm295_vm5, %v292_v51, %v296_v12 }
 0x24e   :  { %v299_v53 = vsel %vm298_vm6, %v297_v52, 0.0 }
 0x24f   :  { %300 = vadd.xlane.f32.xlu0 %v299_v53 }
 0x2dc   :  { %v301_v54 = vpop.xlane.xlu0 %300 }
 0x2dd   :  { %v302_v55 = vrot.slane %v301_v54, 4 }
 0x2df   :  { %v303_v56 = vadd.f32 %v302_v55, %v301_v54 }
 0x2e1   :  { %v304_v57 = vrot.slane %v303_v56, 2 }
 0x2e3   :  { %v305_v58 = vadd.f32 %v304_v57, %v303_v56 }
 0x2e5   :  { %v306_v59 = vrot.slane %v305_v58, 1 }
 0x2e7   :  { %v307_v60 = vadd.f32 %v306_v59, %v305_v58 }
 0x2e9   :  { %342 = vpush %v307_v60 }
 0x31a   :  { %s343_s13 = spop %342 }
 0x31b   :  { %s311_s14 = smul.f32 0.125, %s343_s13 }
 0x31d   :  { %s312_s15 = sadd.f32 0.2857143, %s311_s14 }
 0x31f   :  { %314 = sst [smem:[#allocation8]] %s312_s15 }
 0x320   :  { %438 = shalt.err (!%p435_p0)
}
 0x321   :  { %s451_s18 = smov [#allocation8]  }
 0x322   :  { %322 = dma.smem_to_hbm %s451_s18, 16, %s574_s4, [#allocation4]  }
 0x323   :  { %443 = dma.done.wait [#allocation4], 16  }
 0x324   :  { %444 = vsyncadd [#allocation4], 4294967280 }
 0x325   :  { %326 = sfence }
 0x326   :  { %327 = vsyncpa [#allocation3], 1 }
 0x327   :  { %328 = vsyncpa [#allocation6], 1 }
 0x328   :  { %329 = vsyncpa [#allocation4], 1 }

</bundles_post_ra>
